<compile_context>
chip_gen: v6e
topology: v6e:2x2x1
jax: 0.10.0
libtpu: 0.0.40
codegen_flags: <defaults>
</compile_context>

<pallas_src>
import functools

import jax
import jax.numpy as jnp
from jax.experimental import pallas as pl
from jax.experimental.pallas import tpu as pltpu

# TODO(synk): hparams.ref_level_db value not given in the module; assumed 20.0.
REF_LEVEL_DB = 20.0
PREEMP_COEF = 0.97     # conv weight [-0.97, 1.0] == x[t] - 0.97 * x[t-1]
AMP_EPS = 1e-5


def _round_up(a, b):
    return ((a + b - 1) // b) * b


def _stft_kernel(*refs, n_frames, n_freq, nf_pad, n_shift, ref_db):
    """Compute (spec, |X|) for a tile of frames from hop-sized audio chunks.

    refs: (chunk_ref[, halo_ref], basis_ref, spec_ref, mag_ref)
      chunk_ref: (1, C, hop)   hop-sized rows of padded, pre-emphasized audio
      halo_ref:  (1, H, hop)   next H chunk rows (frame-tiled mode only)
      basis_ref: (n_shift, hop, 2*nf_pad)  windowed [cos | -sin] DFT taps
      spec_ref, mag_ref: (1, n_frames, n_freq)
    """
    if len(refs) == 5:
        chunk_ref, halo_ref, basis_ref, spec_ref, mag_ref = refs
        buf = jnp.concatenate([chunk_ref[0], halo_ref[0]], axis=0)
    else:
        chunk_ref, basis_ref, spec_ref, mag_ref = refs
        buf = chunk_ref[0]

    m8 = _round_up(n_frames, 8)
    # Frame f = concat_j chunk[f + j]  =>  DFT(frame f) = sum_j chunk[f+j] @ basis[j].
    # Each LHS is just a sublane-shifted static slice of the same VMEM buffer.
    # (Default matmul precision already passes the fft tolerances; pass
    #  precision=jax.lax.Precision.HIGHEST here if tighter accuracy is needed.)
    acc = jnp.dot(buf[0:m8, :], basis_ref[0],
                  preferred_element_type=jnp.float32)
    for j in range(1, n_shift):
        acc = acc + jnp.dot(buf[j:j + m8, :], basis_ref[j],
                            preferred_element_type=jnp.float32)

    real = acc[:, :nf_pad]           # 128-lane aligned vreg slices
    imag = acc[:, nf_pad:]
    mag = jnp.sqrt(real * real + imag * imag)
    db = 20.0 * jnp.log10(mag + AMP_EPS) - ref_db

    # Store only the valid frames / real frequency bins (block = final shape).
    mag_ref[0] = mag[:n_frames, :n_freq]
    spec_ref[0] = db[:n_frames, :n_freq]


def _hann_window(win_length):
    # torch.hann_window default (periodic=True)
    n = jnp.arange(win_length, dtype=jnp.float32)
    return 0.5 - 0.5 * jnp.cos(2.0 * jnp.pi * n / win_length)


def _windowed_basis(win_length, hop_length, n_fft, n_shift, nf_pad):
    """(n_shift, hop, 2*nf_pad) = per-chunk [hann*cos | -hann*sin] DFT taps."""
    n_freq = n_fft // 2 + 1
    n = jnp.arange(win_length, dtype=jnp.float32)[:, None]
    k = jnp.arange(n_freq, dtype=jnp.float32)[None, :]
    ang = 2.0 * jnp.pi * n * k / float(n_fft)
    w = _hann_window(win_length)[:, None]
    cos_b = jnp.pad(w * jnp.cos(ang), ((0, 0), (0, nf_pad - n_freq)))
    sin_b = jnp.pad(w * (-jnp.sin(ang)), ((0, 0), (0, nf_pad - n_freq)))
    b2d = jnp.concatenate([cos_b, sin_b], axis=1)                  # (win, 2*nf_pad)
    b2d = jnp.pad(b2d, ((0, n_shift * hop_length - win_length), (0, 0)))
    return b2d.reshape(n_shift, hop_length, 2 * nf_pad)


@functools.partial(
    jax.jit,
    static_argnames=("win_length", "hop_length", "n_fft", "preemp",
                     "ref_level_db", "block_frames"))
def spectrogram(x, *, win_length=64, hop_length=16, n_fft=128, preemp=True,
                ref_level_db=REF_LEVEL_DB, block_frames=1024):
    """JAX/Pallas equivalent of Spectrogram.forward.  x: (B, T) float32."""
    x = x.astype(jnp.float32)
    B, T = x.shape
    win, hop = win_length, hop_length
    n_freq = n_fft // 2 + 1
    nf_pad = _round_up(n_freq, 128)                 # lane-dense freq axis in-kernel
    n_shift = -(-win // hop)                        # chunk rows touched per frame
    halo = max(8, _round_up(max(n_shift - 1, 1), 8))

    # --- pre-emphasis: Conv1d(1,1,2, padding=1, w=[-0.97, 1.0]), drop last sample ---
    # TODO(synk): kept in the wrapper (one fused XLA pass) because the module
    # applies pre-emphasis BEFORE the constant pad; folding it into the DFT
    # basis would change the value at the signal/right-pad boundary.
    if preemp:
        x = x - PREEMP_COEF * jnp.pad(x, ((0, 0), (1, 0)))[:, :-1]

    # num frames of torch.stft(F.pad(x, (win, win)), frame_length=win, hop)
    F = (T + win) // hop + 1

    # --- frame-axis tiling ---
    tile = None
    if F > block_frames:
        tile = _round_up(block_frames, halo)
    elif B < 2 and F > 2 * halo:
        tile = _round_up(-(-F // 2), halo)          # give both v7x TCs a tile

    if tile is None:
        num_chunks = _round_up(F, 8) + halo
        frames_padded = F
        grid = (B,)
    else:
        num_tiles = -(-F // tile)
        frames_padded = num_tiles * tile
        num_chunks = frames_padded + tile           # divisible by tile and halo
        grid = (B, num_tiles)

    # Padded audio as hop-sized chunk rows (single materialization; the old
    # 4x frames gather and the Mp pad copy no longer exist).
    pad_right = num_chunks * hop - (T + win)
    xp = jnp.pad(x, ((0, 0), (win, pad_right)))
    chunks = xp.reshape(B, num_chunks, hop)

    basis = _windowed_basis(win, hop, n_fft, n_shift, nf_pad)

    kernel = functools.partial(
        _stft_kernel,
        n_frames=(F if tile is None else tile),
        n_freq=n_freq, nf_pad=nf_pad, n_shift=n_shift,
        ref_db=float(ref_level_db))

    out_sds = jax.ShapeDtypeStruct((B, frames_padded, n_freq), jnp.float32)

    if tile is None:
        # One block per batch row; outputs already have their final shape.
        in_specs = [
            pl.BlockSpec((1, num_chunks, hop), lambda b: (b, 0, 0)),
            pl.BlockSpec((n_shift, hop, 2 * nf_pad), lambda b: (0, 0, 0)),
        ]
        out_spec = pl.BlockSpec((1, F, n_freq), lambda b: (b, 0, 0))
        operands = (chunks, basis)
        semantics = ("parallel",)
    else:
        # Frame-tiled path: main (tile, hop) block plus an 8*k-row halo block
        # taken from the SAME chunk array at a block-aligned offset.
        blocks_per_tile = tile // halo
        in_specs = [
            pl.BlockSpec((1, tile, hop), lambda b, i: (b, i, 0)),
            pl.BlockSpec((1, halo, hop),
                         lambda b, i: (b, (i + 1) * blocks_per_tile, 0)),
            pl.BlockSpec((n_shift, hop, 2 * nf_pad), lambda b, i: (0, 0, 0)),
        ]
        out_spec = pl.BlockSpec((1, tile, n_freq), lambda b, i: (b, i, 0))
        operands = (chunks, chunks, basis)
        semantics = ("parallel", "parallel")

    spec, mag = pl.pallas_call(
        kernel,
        out_shape=(out_sds, out_sds),
        grid_spec=pltpu.PrefetchScalarGridSpec(
            num_scalar_prefetch=0,
            grid=grid,
            in_specs=in_specs,
            out_specs=[out_spec, out_spec]),
        compiler_params=pltpu.CompilerParams(dimension_semantics=semantics),
    )(*operands)

    if frames_padded != F:
        spec = spec[:, :F]
        mag = mag[:, :F]
    return spec, mag


def _reference(x, *, win_length, hop_length, n_fft, preemp=True,
               ref_level_db=REF_LEVEL_DB):
    """Pure-JAX reference for a correctness sanity check."""
    x = x.astype(jnp.float32)
    if preemp:
        x_prev = jnp.pad(x, ((0, 0), (1, 0)))[:, :-1]
        x = x - PREEMP_COEF * x_prev
    xp = jnp.pad(x, ((0, 0), (win_length, win_length)))
    L = xp.shape[-1]
    num_frames = (L - win_length) // hop_length + 1
    idx = (jnp.arange(num_frames)[:, None] * hop_length
           + jnp.arange(win_length)[None, :])
    frames = xp[:, idx] * _hann_window(win_length)[None, None, :]
    frames_padded = jnp.pad(frames, ((0, 0), (0, 0), (0, n_fft - win_length)))
    fft = jnp.fft.rfft(frames_padded, n=n_fft, axis=-1)
    p = jnp.abs(fft).astype(jnp.float32)
    spec = 20.0 * jnp.log10(p + AMP_EPS) - ref_level_db
    return spec, p


if __name__ == "__main__":
    key = jax.random.PRNGKey(0)
    win_length, hop_length, n_fft = 64, 16, 128

    B, T = 2, 256
    x = jax.random.normal(key, (B, T), dtype=jnp.float32)

    # --- default path: one block per batch row, exact output shapes ---
    spec, p = spectrogram(x, win_length=win_length, hop_length=hop_length,
                          n_fft=n_fft, preemp=True)
    jax.block_until_ready((spec, p))

    spec_ref, p_ref = _reference(x, win_length=win_length,
                                 hop_length=hop_length, n_fft=n_fft,
                                 preemp=True)
    assert spec.shape == spec_ref.shape and p.shape == p_ref.shape
    assert jnp.allclose(p, p_ref, atol=1e-3, rtol=1e-3)
    assert jnp.allclose(spec, spec_ref, atol=1e-2, rtol=1e-3)

    # --- forced frame-tiled path (exercises the halo / multi-tile kernel) ---
    spec_t, p_t = spectrogram(x, win_length=win_length, hop_length=hop_length,
                              n_fft=n_fft, preemp=True, block_frames=8)
    jax.block_until_ready((spec_t, p_t))
    assert jnp.allclose(p_t, p_ref, atol=1e-3, rtol=1e-3)
    assert jnp.allclose(spec_t, spec_ref, atol=1e-2, rtol=1e-3)

    # --- B == 1 path (frame axis auto-split so both v7x TCs get a tile) ---
    x1 = x[:1]
    spec_1, p_1 = spectrogram(x1, win_length=win_length,
                              hop_length=hop_length, n_fft=n_fft, preemp=True)
    jax.block_until_ready((spec_1, p_1))
    spec1_ref, p1_ref = _reference(x1, win_length=win_length,
                                   hop_length=hop_length, n_fft=n_fft,
                                   preemp=True)
    assert jnp.allclose(p_1, p1_ref, atol=1e-3, rtol=1e-3)
    assert jnp.allclose(spec_1, spec1_ref, atol=1e-2, rtol=1e-3)

    print("KERNEL_OK")
</pallas_src>

<mosaic_0001>
module attributes {stable_mosaic.version = 11 : i64} {
  func.func @_stft_kernel(%arg0: i32, %arg1: memref<1x32x16xf32, #tpu.memory_space<vmem>>, %arg2: memref<4x16x256xf32, #tpu.memory_space<vmem>>, %arg3: memref<1x21x65xf32, #tpu.memory_space<vmem>>, %arg4: memref<1x21x65xf32, #tpu.memory_space<vmem>>) attributes {dimension_semantics = [#tpu.dimension_semantics<parallel>], iteration_bounds = array<i64: 2>, scalar_prefetch = 0 : i64, scratch_operands = 0 : i64, tpu.core_type = #tpu.core_type<tc>, window_params = [{transform_indices = @transform_0, window_bounds = array<i64: 1, 32, 16>}, {pipeline_mode = #tpu.pipeline_mode<synchronous>, transform_indices = @transform_1, window_bounds = array<i64: 4, 16, 256>}, {transform_indices = @transform_2, window_bounds = array<i64: 1, 21, 65>}, {transform_indices = @transform_3, window_bounds = array<i64: 1, 21, 65>}]} {
    %c0 = arith.constant 0 : index
    %c0_0 = arith.constant 0 : index
    %c0_1 = arith.constant 0 : index
    %0 = vector.load %arg1[%c0, %c0_0, %c0_1] : memref<1x32x16xf32, #tpu.memory_space<vmem>>, vector<1x32x16xf32>
    %1 = vector.shape_cast %0 : vector<1x32x16xf32> to vector<32x16xf32>
    %2 = vector.extract_strided_slice %1 {offsets = [0, 0], sizes = [24, 16], strides = [1, 1]} : vector<32x16xf32> to vector<24x16xf32>
    %c0_2 = arith.constant 0 : index
    %c0_3 = arith.constant 0 : index
    %c0_4 = arith.constant 0 : index
    %3 = vector.load %arg2[%c0_2, %c0_3, %c0_4] : memref<4x16x256xf32, #tpu.memory_space<vmem>>, vector<1x16x256xf32>
    %4 = vector.shape_cast %3 : vector<1x16x256xf32> to vector<16x256xf32>
    %cst = arith.constant dense<0.000000e+00> : vector<24x256xf32>
    %5 = tpu.matmul %2, %4, %cst {dimension_numbers = #tpu.dot_dimension_numbers<[1], [0], [0], [1], [0, 0, 1, 1], [], []>} : vector<24x16xf32>, vector<16x256xf32>, vector<24x256xf32> -> vector<24x256xf32>
    %6 = vector.extract_strided_slice %1 {offsets = [1, 0], sizes = [24, 16], strides = [1, 1]} : vector<32x16xf32> to vector<24x16xf32>
    %c1 = arith.constant 1 : index
    %c0_5 = arith.constant 0 : index
    %c0_6 = arith.constant 0 : index
    %7 = vector.load %arg2[%c1, %c0_5, %c0_6] : memref<4x16x256xf32, #tpu.memory_space<vmem>>, vector<1x16x256xf32>
    %8 = vector.shape_cast %7 : vector<1x16x256xf32> to vector<16x256xf32>
    %cst_7 = arith.constant dense<0.000000e+00> : vector<24x256xf32>
    %9 = tpu.matmul %6, %8, %cst_7 {dimension_numbers = #tpu.dot_dimension_numbers<[1], [0], [0], [1], [0, 0, 1, 1], [], []>} : vector<24x16xf32>, vector<16x256xf32>, vector<24x256xf32> -> vector<24x256xf32>
    %10 = arith.addf %5, %9 : vector<24x256xf32>
    %11 = vector.extract_strided_slice %1 {offsets = [2, 0], sizes = [24, 16], strides = [1, 1]} : vector<32x16xf32> to vector<24x16xf32>
    %c2 = arith.constant 2 : index
    %c0_8 = arith.constant 0 : index
    %c0_9 = arith.constant 0 : index
    %12 = vector.load %arg2[%c2, %c0_8, %c0_9] : memref<4x16x256xf32, #tpu.memory_space<vmem>>, vector<1x16x256xf32>
    %13 = vector.shape_cast %12 : vector<1x16x256xf32> to vector<16x256xf32>
    %cst_10 = arith.constant dense<0.000000e+00> : vector<24x256xf32>
    %14 = tpu.matmul %11, %13, %cst_10 {dimension_numbers = #tpu.dot_dimension_numbers<[1], [0], [0], [1], [0, 0, 1, 1], [], []>} : vector<24x16xf32>, vector<16x256xf32>, vector<24x256xf32> -> vector<24x256xf32>
    %15 = arith.addf %10, %14 : vector<24x256xf32>
    %16 = vector.extract_strided_slice %1 {offsets = [3, 0], sizes = [24, 16], strides = [1, 1]} : vector<32x16xf32> to vector<24x16xf32>
    %c3 = arith.constant 3 : index
    %c0_11 = arith.constant 0 : index
    %c0_12 = arith.constant 0 : index
    %17 = vector.load %arg2[%c3, %c0_11, %c0_12] : memref<4x16x256xf32, #tpu.memory_space<vmem>>, vector<1x16x256xf32>
    %18 = vector.shape_cast %17 : vector<1x16x256xf32> to vector<16x256xf32>
    %cst_13 = arith.constant dense<0.000000e+00> : vector<24x256xf32>
    %19 = tpu.matmul %16, %18, %cst_13 {dimension_numbers = #tpu.dot_dimension_numbers<[1], [0], [0], [1], [0, 0, 1, 1], [], []>} : vector<24x16xf32>, vector<16x256xf32>, vector<24x256xf32> -> vector<24x256xf32>
    %20 = arith.addf %15, %19 : vector<24x256xf32>
    %21 = vector.extract_strided_slice %20 {offsets = [0, 0], sizes = [24, 128], strides = [1, 1]} : vector<24x256xf32> to vector<24x128xf32>
    %22 = vector.extract_strided_slice %20 {offsets = [0, 128], sizes = [24, 128], strides = [1, 1]} : vector<24x256xf32> to vector<24x128xf32>
    %23 = arith.mulf %21, %21 : vector<24x128xf32>
    %24 = arith.mulf %22, %22 : vector<24x128xf32>
    %25 = arith.addf %23, %24 : vector<24x128xf32>
    %26 = math.sqrt %25 : vector<24x128xf32>
    %cst_14 = arith.constant 9.99999974E-6 : f32
    %27 = vector.broadcast %cst_14 : f32 to vector<24x128xf32>
    %28 = arith.addf %26, %27 : vector<24x128xf32>
    %29 = math.log %28 : vector<24x128xf32>
    %cst_15 = arith.constant 0.434294492 : f32
    %30 = vector.broadcast %cst_15 : f32 to vector<24x128xf32>
    %31 = arith.mulf %29, %30 : vector<24x128xf32>
    %cst_16 = arith.constant 2.000000e+01 : f32
    %32 = vector.broadcast %cst_16 : f32 to vector<24x128xf32>
    %33 = arith.mulf %32, %31 : vector<24x128xf32>
    %cst_17 = arith.constant 2.000000e+01 : f32
    %34 = vector.broadcast %cst_17 : f32 to vector<24x128xf32>
    %35 = arith.subf %33, %34 : vector<24x128xf32>
    %36 = vector.extract_strided_slice %26 {offsets = [0, 0], sizes = [21, 65], strides = [1, 1]} : vector<24x128xf32> to vector<21x65xf32>
    %c0_18 = arith.constant 0 : index
    %c0_19 = arith.constant 0 : index
    %c0_20 = arith.constant 0 : index
    %37 = vector.load %arg4[%c0_18, %c0_19, %c0_20] : memref<1x21x65xf32, #tpu.memory_space<vmem>>, vector<1x21x65xf32>
    %38 = vector.shape_cast %37 : vector<1x21x65xf32> to vector<21x65xf32>
    %39 = vector.shape_cast %36 : vector<21x65xf32> to vector<1x21x65xf32>
    tpu.vector_store %arg4[%c0_18, %c0_19, %c0_20], %39 {strides = array<i32>} : memref<1x21x65xf32, #tpu.memory_space<vmem>>, vector<1x21x65xf32>,
    %40 = vector.extract_strided_slice %35 {offsets = [0, 0], sizes = [21, 65], strides = [1, 1]} : vector<24x128xf32> to vector<21x65xf32>
    %c0_21 = arith.constant 0 : index
    %c0_22 = arith.constant 0 : index
    %c0_23 = arith.constant 0 : index
    %41 = vector.load %arg3[%c0_21, %c0_22, %c0_23] : memref<1x21x65xf32, #tpu.memory_space<vmem>>, vector<1x21x65xf32>
    %42 = vector.shape_cast %41 : vector<1x21x65xf32> to vector<21x65xf32>
    %43 = vector.shape_cast %40 : vector<21x65xf32> to vector<1x21x65xf32>
    tpu.vector_store %arg3[%c0_21, %c0_22, %c0_23], %43 {strides = array<i32>} : memref<1x21x65xf32, #tpu.memory_space<vmem>>, vector<1x21x65xf32>,
    return
  }
  func.func @transform_0(%arg0: i32) -> (i32, i32, i32) {
    %c0_i32 = arith.constant 0 : i32
    %c0_i32_0 = arith.constant 0 : i32
    %c0_i32_1 = arith.constant 0 : i32
    return %arg0, %c0_i32, %c0_i32_0 : i32, i32, i32
  }
  func.func @transform_1(%arg0: i32) -> (i32, i32, i32) {
    %c0_i32 = arith.constant 0 : i32
    %c0_i32_0 = arith.constant 0 : i32
    %c0_i32_1 = arith.constant 0 : i32
    %c0_i32_2 = arith.constant 0 : i32
    return %c0_i32, %c0_i32_0, %c0_i32_1 : i32, i32, i32
  }
  func.func @transform_2(%arg0: i32) -> (i32, i32, i32) {
    %c0_i32 = arith.constant 0 : i32
    %c0_i32_0 = arith.constant 0 : i32
    %c0_i32_1 = arith.constant 0 : i32
    return %arg0, %c0_i32, %c0_i32_0 : i32, i32, i32
  }
  func.func @transform_3(%arg0: i32) -> (i32, i32, i32) {
    %c0_i32 = arith.constant 0 : i32
    %c0_i32_0 = arith.constant 0 : i32
    %c0_i32_1 = arith.constant 0 : i32
    return %arg0, %c0_i32, %c0_i32_0 : i32, i32, i32
  }
}

</mosaic_0001>

<bundles_post_ra>
// kernel: spectrogram.1
= control target key start
LH: loop header
LB: loop body
LE: loop exit
PB: predicated region body
PF: predicated region fallthrough
CT: control target
= control target key end

     0   :  { %s838_s12 = smov 0   ;;  %s953_s0 = inlined_call_operand.vmem [shape: f32[2,32,16], index: 0, kind: input, shape index: {}]   ;;  %s954_s1 = inlined_call_operand.vmem [shape: f32[4,16,256], index: 1, kind: input, shape index: {}]   ;;  %s955_s2 = inlined_call_operand.vmem [shape: f32[2,21,65], index: 2, kind: output, shape index: {0}]   ;;  %s956_s3 = inlined_call_operand.vmem [shape: f32[2,21,65], index: 3, kind: output, shape index: {1}]  }
   0x1 LB: > { %s748_s13 = sadd.s32 4294967295, %s815_s12   ;;  %p752_p0 = scmp.ge.s32.totalorder %s815_s12, 1  ;;  %s815_s12 = sphi %s838_s12, %s14_s12  }
   0x2   : > { %p140_p1 = scmp.lt.s32.totalorder %s815_s12, 3 }
   0x4   : > { %p141_p2 = pnand %p752_p0, %p140_p1 }
   0x5   : > { %p169_p3 = scmp.lt.s32.totalorder (!%p141_p2), %s748_s13, 1 }
   0x6   : > { %144 = sbr.rel (%p141_p2) target bundleno = 287 (0x11f), region = 28 }
   0xb   : > { %v760_v0 = vld [vmem:[%s954_s1 + $0x38] sm:$0xff]  ;;  %v759_v1 = vld [vmem:[%s954_s1 + $0x30] sm:$0xff]  ;;  %v758_v3 = vld [vmem:[%s954_s1 + $0x28] sm:$0xff]  ;;  %s958_s13 = smov (!%p169_p3, %s748_s13), 1  ;;  %v817_v10 = vmov 0.0   ;;  %vm209_vm0 = vcmask 130048  }
   0xc   : > { %v191_v2 = vld [vmem:[%s954_s1 + $0x18] sm:$0xff]  ;;  %244 = vmatprep.subr.mxu0 %v760_v0  ;;  %v190_v4 = vld [vmem:[%s954_s1 + $0x10] sm:$0xff]  ;;  %v757_v5 = vld [vmem:[%s954_s1 + $0x20] sm:$0xff]  ;;  %280 = vmatprep.mubr.f32.mxu0 %v817_v10  ;;  %s786_s7 = sshll.u32 %s958_s13, 5  ;;  %vm201_vm1 = vcmask 1046528   ;;  %vm501_vm2 = vcmask 1044480  }
   0xd   : > { %333 = vmatprep.subr.mxu1 %v191_v2  ;;  %245 = vmatpush1.msra.mxu0 %v759_v1  ;;  %v189_v6 = vld [vmem:[%s954_s1 + $0x8] sm:$0xff]  ;;  %v188_v7 = vld [vmem:[%s954_s1] sm:$0xff]  ;;  %v770_v8 = vld [vmem:[%s954_s1 + $0x58] sm:$0xff]  ;;  %s173_s10 = scalar_lea.vmem %s953_s0, %s786_s7  ;;  %vm393_vm3 = vcmask 1045504   ;;  %s787_s25 = smul.u32 24, %s958_s13  ;;  %vm652_vm5 = vcmask 531456  }
   0xe   : > { %334 = vmatpush1.msra.mxu1 %v190_v4  ;;  %246 = vmatprep.subr.mxu0 %v758_v3  ;;  %v777_v9 = vld [vmem:[%s954_s1 + $0x78] sm:$0xff]  ;;  %v776_v11 = vld [vmem:[%s954_s1 + $0x70] sm:$0xff]  ;;  %v775_v12 = vld [vmem:[%s954_s1 + $0x68] sm:$0xff]  ;;  %vm655_vm10 = vcmask 528384  }
   0xf   : > { %335 = vmatprep.subr.mxu1 %v189_v6  ;;  %247 = vmatpush1.msra.mxu0 %v757_v5  ;;  %v184_v13 = vld [vmem:[%s173_s10] sm:$0xff]  ;;  %v185_v14 = vld [vmem:[%s173_s10 + $0x8] sm:$0xff]  ;;  %v186_v15 = vld [vmem:[%s173_s10 + $0x10] sm:$0xff]  ;;  %s183_s28 = scalar_lea.vmem %s956_s3, %s787_s25  ;;  %s178_s4 = scalar_lea.vmem %s955_s2, %s787_s25 }
  0x10   : > { %336 = vmatpush1.msra.mxu1 %v188_v7  ;;  %369 = vmatprep.mubr.f32.mxu1 %v817_v10  ;;  %v202_v16 = vrot.slane %v184_v13, 1  ;;  %v203_v17 = vrot.slane %v185_v14, 1  ;;  %v205_v18 = vrot.slane %v186_v15, 1  ;;  %v774_v19 = vld [vmem:[%s954_s1 + $0x60] sm:$0xff]  ;;  %v769_v20 = vld [vmem:[%s954_s1 + $0x50] sm:$0xff]  ;;  %v187_v21 = vld [vmem:[%s173_s10 + $0x18] sm:$0xff] }
  0x11   : > { %435 = vmatprep.subr.mxu0 %v770_v8  ;;  %543 = vmatprep.subr.mxu1 %v777_v9  ;;  %v768_v23 = vld [vmem:[%s954_s1 + $0x48] sm:$0xff]  ;;  %v767_v24 = vld [vmem:[%s954_s1 + $0x40] sm:$0xff]  ;;  %v207_v26 = vrot.slane %v187_v21, 1  ;;  %v502_v27 = vrot.slane %v184_v13, 3  ;;  %v503_v28 = vrot.slane %v185_v14, 3  ;;  %v394_v30 = vrot.slane %v184_v13, 2 }
  0x12   : > { %764 = vmatmul.mubr.msk.f32.vlgmr.msra.gmra.mxu1 %vm209_vm0, %v184_v13  ;;  %v204_v22 = vsel %vm201_vm1, %v202_v16, %v203_v17  ;;  %v206_v25 = vsel %vm201_vm1, %v203_v17, %v205_v18  ;;  %v395_v31 = vrot.slane %v185_v14, 2  ;;  %v505_v33 = vrot.slane %v186_v15, 3 }
  0x13   : > { %544 = vmatpush1.msra.mxu1 %v776_v11  ;;  %375 = vmatprep.mubr.f32.mxu1 %v817_v10  ;;  %v208_v29 = vsel %vm201_vm1, %v205_v18, %v207_v26  ;;  %v504_v32 = vsel %vm501_vm2, %v502_v27, %v503_v28  ;;  %v397_v35 = vrot.slane %v186_v15, 2  ;;  %v507_v37 = vrot.slane %v187_v21, 3 }
  0x14   : > { %545 = vmatprep.subr.mxu1 %v775_v12  ;;  %761 = vmatmul.mubr.msk.f32.vlgmr.msra.gmra.mxu0 %vm209_vm0, %v204_v22  ;;  %v396_v34 = vsel %vm393_vm3, %v394_v30, %v395_v31  ;;  %v506_v36 = vsel %vm501_vm2, %v503_v28, %v505_v33  ;;  %v399_v39 = vrot.slane %v187_v21, 2 }
  0x15   : > { %546 = vmatpush1.msra.mxu1 %v774_v19  ;;  %436 = vmatpush1.msra.mxu0 %v769_v20  ;;  %v398_v38 = vsel %vm393_vm3, %v395_v31, %v397_v35  ;;  %v508_v40 = vsel %vm501_vm2, %v505_v33, %v507_v37 }
  0x16   : > { %286 = vmatprep.mubr.f32.mxu0 %v817_v10  ;;  %765 = vmatmul.mubr.msk.f32.gmra.mxu1 %vm209_vm0, %v185_v14  ;;  %v400_v41 = vsel %vm393_vm3, %v397_v35, %v399_v39 }
  0x17   : > { %437 = vmatprep.subr.mxu0 %v768_v23  ;;  %381 = vmatprep.mubr.f32.mxu1 %v817_v10 }
  0x18   : > { %438 = vmatpush1.msra.mxu0 %v767_v24 }
  0x19   : > { %762 = vmatmul.mubr.msk.f32.gmra.mxu0 %vm209_vm0, %v206_v25 }
  0x1a   : > { %292 = vmatprep.mubr.f32.mxu0 %v817_v10  ;;  %766 = vmatmul.mubr.msk.f32.gmra.mxu1 %vm209_vm0, %v186_v15 }
  0x1b   : > { %579 = vmatprep.mubr.f32.mxu1 %v817_v10 }
  0x1d   : > { %763 = vmatmul.mubr.msk.f32.gmra.mxu0 %vm209_vm0, %v208_v29 }
  0x1e   : > { %471 = vmatprep.mubr.f32.mxu0 %v817_v10  ;;  %778 = vmatmul.mubr.msk.f32.vlgmr.msra.gmra.mxu1 %vm209_vm0, %v504_v32 }
  0x1f   : > { %585 = vmatprep.mubr.f32.mxu1 %v817_v10 }
  0x21   : > { %771 = vmatmul.mubr.msk.f32.vlgmr.msra.gmra.mxu0 %vm209_vm0, %v396_v34 }
  0x22   : > { %477 = vmatprep.mubr.f32.mxu0 %v817_v10  ;;  %779 = vmatmul.mubr.msk.f32.gmra.mxu1 %vm209_vm0, %v506_v36 }
  0x23   : > { %591 = vmatprep.mubr.f32.mxu1 %v817_v10 }
  0x25   : > { %772 = vmatmul.mubr.msk.f32.gmra.mxu0 %vm209_vm0, %v398_v38 }
  0x26   : > { %483 = vmatprep.mubr.f32.mxu0 %v817_v10  ;;  %780 = vmatmul.mubr.msk.f32.gmra.mxu1 %vm209_vm0, %v508_v40 }
  0x29   : > { %773 = vmatmul.mubr.msk.f32.gmra.mxu0 %vm209_vm0, %v400_v41 }
  0xd2   : > { %v371_v42 = vpop.f32.mrf.mxu1 }
  0xd4   : > { %v373_v43 = vpop.f32.mrf.mxu1  ;;  %v282_v44 = vpop.f32.mrf.mxu0 }
  0xd5   : > { %v372_v55 = vadd.f32 %v371_v42, %v282_v44 }
  0xd6   : > { %v284_v45 = vpop.f32.mrf.mxu0  ;;  %v377_v46 = vpop.f32.mrf.mxu1 }
  0xd7   : > { %v374_v58 = vadd.f32 %v373_v43, %v284_v45 }
  0xd8   : > { %v379_v48 = vpop.f32.mrf.mxu1 }
  0xd9   : > { %v288_v47 = vpop.f32.mrf.mxu0 }
  0xda   : > { %v383_v50 = vpop.f32.mrf.mxu1  ;;  %v378_v62 = vadd.f32 %v377_v46, %v288_v47 }
  0xdb   : > { %v290_v49 = vpop.f32.mrf.mxu0 }
  0xdc   : > { %v385_v52 = vpop.f32.mrf.mxu1  ;;  %v380_v2 = vadd.f32 %v379_v48, %v290_v49 }
  0xdd   : > { %v294_v51 = vpop.f32.mrf.mxu0 }
  0xde   : > { %v581_v54 = vpop.f32.mrf.mxu1  ;;  %v384_v7 = vadd.f32 %v383_v50, %v294_v51 }
  0xdf   : > { %v296_v53 = vpop.f32.mrf.mxu0 }
  0xe0   : > { %v583_v57 = vpop.f32.mrf.mxu1  ;;  %v386_v17 = vadd.f32 %v385_v52, %v296_v53 }
  0xe1   : > { %v473_v56 = vpop.f32.mrf.mxu0 }
  0xe2   : > { %v490_v59 = vadd.f32 %v473_v56, %v372_v55  ;;  %v587_v61 = vpop.f32.mrf.mxu1 }
  0xe3   : > { %v475_v60 = vpop.f32.mrf.mxu0 }
  0xe4   : > { %v598_v63 = vadd.f32 %v581_v54, %v490_v59  ;;  %v491_v0 = vadd.f32 %v475_v60, %v374_v58  ;;  %v589_v5 = vpop.f32.mrf.mxu1 }
  0xe5   : > { %v479_v1 = vpop.f32.mrf.mxu0 }
  0xe6   : > { %v599_v3 = vadd.f32 %v583_v57, %v491_v0  ;;  %v492_v4 = vadd.f32 %v479_v1, %v378_v62  ;;  %v604_v8 = vmul.f32 %v598_v63, %v598_v63  ;;  %v593_v16 = vpop.f32.mrf.mxu1 }
  0xe7   : > { %v481_v6 = vpop.f32.mrf.mxu0 }
  0xe8   : > { %v607_v9 = vmul.f32 %v599_v3, %v599_v3  ;;  %v493_v10 = vadd.f32 %v481_v6, %v380_v2  ;;  %v600_v11 = vadd.f32 %v587_v61, %v492_v4  ;;  %v595_v23 = vpop.f32.mrf.mxu1 }
  0xe9   : > { %v485_v12 = vpop.f32.mrf.mxu0 }
  0xea   : > { %v610_v13 = vadd.f32 %v607_v9, %v604_v8  ;;  %v601_v14 = vadd.f32 %v589_v5, %v493_v10  ;;  %v494_v15 = vadd.f32 %v485_v12, %v384_v7  ;;  %v605_v19 = vmul.f32 %v600_v11, %v600_v11 }
  0xeb   : > { %v487_v18 = vpop.f32.mrf.mxu0 }
  0xec   : > { %797 = vrsqrt.f32 %v610_v13  ;;  %v608_v20 = vmul.f32 %v601_v14, %v601_v14  ;;  %v495_v21 = vadd.f32 %v487_v18, %v386_v17  ;;  %v602_v22 = vadd.f32 %v593_v16, %v494_v15 }
  0xed   : > { %vm615_vm4 = vcmp.eq.f32.partialorder %v610_v13, inf  ;;  %v618_v31 = vand.u32 2147483648, %v610_v13  ;;  %vm617_vm6 = vcmp.eq.f32.partialorder %v610_v13, 0.0 }
  0xee   : > { %v611_v24 = vadd.f32 %v608_v20, %v605_v19  ;;  %v603_v25 = vadd.f32 %v595_v23, %v495_v21  ;;  %v606_v26 = vmul.f32 %v602_v22, %v602_v22 }
  0xf0   : > { %799 = vrsqrt.f32 %v611_v24  ;;  %v609_v27 = vmul.f32 %v603_v25, %v603_v25  ;;  %vm622_vm7 = vcmp.eq.f32.partialorder %v611_v24, inf  ;;  %v625_v37 = vand.u32 2147483648, %v611_v24 }
  0xf1   : > { %vm624_vm8 = vcmp.eq.f32.partialorder %v611_v24, 0.0 }
  0xf2   : > { %v612_v28 = vadd.f32 %v609_v27, %v606_v26 }
  0xf4   : > { %801 = vrsqrt.f32 %v612_v28  ;;  %vm629_vm9 = vcmp.eq.f32.partialorder %v612_v28, inf  ;;  %v632_v43 = vand.u32 2147483648, %v612_v28  ;;  %vm631_vm11 = vcmp.eq.f32.partialorder %v612_v28, 0.0 }
  0xf9   : > { %v798_v29 = vpop.eup %797 }
  0xfa   : > { %v614_v30 = vmul.f32 %v798_v29, %v610_v13 }
  0xfc   : > { %v616_v32 = vsel %vm615_vm4, %v610_v13, %v614_v30 }
  0xfd   : > { %v619_v33 = vsel %vm617_vm6, %v618_v31, %v616_v32  ;;  %v800_v34 = vpop.eup %799 }
  0xfe   : > { %v634_v35 = vadd.f32 1e-05, %v619_v33  ;;  %653 = vst.msk [vmem:[%s183_s28] sm:$0xff] %vm652_vm5, %v619_v33  ;;  %v621_v36 = vmul.f32 %v800_v34, %v611_v24 }
 0x100   : > { %803 = vlog2.f32 %v634_v35  ;;  %v623_v38 = vsel %vm622_vm7, %v611_v24, %v621_v36 }
 0x101   : > { %v626_v39 = vsel %vm624_vm8, %v625_v37, %v623_v38  ;;  %v802_v40 = vpop.eup %801 }
 0x102   : > { %v635_v41 = vadd.f32 1e-05, %v626_v39  ;;  %654 = vst.msk [vmem:[%s183_s28 + $0x8] sm:$0xff] %vm652_vm5, %v626_v39  ;;  %v628_v42 = vmul.f32 %v802_v40, %v612_v28 }
 0x104   : > { %805 = vlog2.f32 %v635_v41  ;;  %v630_v44 = vsel %vm629_vm9, %v612_v28, %v628_v42 }
 0x105   : > { %v633_v45 = vsel %vm631_vm11, %v632_v43, %v630_v44 }
 0x106   : > { %v636_v46 = vadd.f32 1e-05, %v633_v45  ;;  %656 = vst.msk [vmem:[%s183_s28 + $0x10] sm:$0x1f] %vm655_vm10, %v633_v45 }
 0x108   : > { %807 = vlog2.f32 %v636_v46 }
 0x10d   : > { %v804_v47 = vpop.eup %803 }
 0x10e   : > { %v638_v48 = vmul.f32 0.6931472, %v804_v47 }
 0x110   : > { %v643_v49 = vmul.f32 0.4342945, %v638_v48 }
 0x111   : > { %v806_v50 = vpop.eup %805 }
 0x112   : > { %v646_v51 = vmul.f32 20.0, %v643_v49  ;;  %v640_v52 = vmul.f32 0.6931472, %v806_v50 }
 0x114   : > { %v781_v53 = vadd.f32 -20.0, %v646_v51  ;;  %v644_v54 = vmul.f32 0.4342945, %v640_v52 }
 0x115   : > { %v808_v55 = vpop.eup %807 }
 0x116   : > { %657 = vst.msk [vmem:[%s178_s4] sm:$0xff] %vm652_vm5, %v781_v53  ;;  %v647_v56 = vmul.f32 20.0, %v644_v54  ;;  %v642_v57 = vmul.f32 0.6931472, %v808_v55 }
 0x118   : > { %v782_v58 = vadd.f32 -20.0, %v647_v56  ;;  %v645_v59 = vmul.f32 0.4342945, %v642_v57 }
 0x11a   : > { %658 = vst.msk [vmem:[%s178_s4 + $0x8] sm:$0xff] %vm652_vm5, %v782_v58  ;;  %v648_v60 = vmul.f32 20.0, %v645_v59 }
 0x11c   : > { %v783_v61 = vadd.f32 -20.0, %v648_v60 }
 0x11e   : > { %659 = vst.msk [vmem:[%s178_s4 + $0x10] sm:$0x1f] %vm655_vm10, %v783_v61 }
 0x11f PF: > { %s14_s12 = sadd.s32 1, %s815_s12  }
 0x120   : > { %p11_p4 = scmp.ge.s32.totalorder %s14_s12, 4  }
 0x122   :  { %13 = sbr.rel (!%p11_p4) target bundleno = 1 (0x1), region = 73 }

</bundles_post_ra>
